<compile_context>
chip_gen: v7x
topology: tpu7x:2x2x1
jax: 0.10.0
libtpu: 0.0.40
codegen_flags: <defaults>
</compile_context>

<pallas_src>
import functools

import jax
import jax.numpy as jnp
from jax.experimental import pallas as pl
from jax.experimental.pallas import tpu as pltpu

_VMEM = pl.BlockSpec(memory_space=pltpu.MemorySpace.VMEM)


# ------------------------------ helpers ------------------------------------

def _layernorm(x, g, b, eps):
    mu = jnp.mean(x, axis=-1, keepdims=True)
    d = x - mu
    var = jnp.mean(d * d, axis=-1, keepdims=True)
    return d * jax.lax.rsqrt(var + eps) * g + b


# ------------------- embedding LayerNorm (no residual) ----------------------

def _ln_kernel(x_ref, g_ref, b_ref, o_ref, *, eps):
    o_ref[...] = _layernorm(x_ref[...], g_ref[...], b_ref[...], eps)


def pallas_layernorm(x, gamma, beta, eps=1e-12):
    return pl.pallas_call(
        functools.partial(_ln_kernel, eps=eps),
        out_shape=jax.ShapeDtypeStruct(x.shape, jnp.float32),
        in_specs=[_VMEM, _VMEM, _VMEM],
        out_specs=_VMEM,
    )(x, gamma, beta)


# ---------------------- fused transformer layer kernel ----------------------

def _encoder_layer_kernel(x_ref, mask_ref,
                          wqkv_ref, bqkv_ref, wo_ref, bo_ref,
                          ln1_g_ref, ln1_b_ref,
                          w1_ref, b1_ref, w2_ref, b2_ref,
                          ln2_g_ref, ln2_b_ref,
                          o_ref, *, num_heads, head_dim, eps):
    hidden = num_heads * head_dim
    scale = 1.0 / float(head_dim) ** 0.5

    x = x_ref[0]                                   # (S, H) f32 for this batch element
    mask = mask_ref[0]                             # (1, S) f32
    bias = (1.0 - mask) * -10000.0                 # additive attention bias over keys

    # Fused QKV projection: one (S, H) @ (H, 3H) matmul (bf16 MXU, f32 acc).
    qkv = jnp.dot(x.astype(jnp.bfloat16), wqkv_ref[...],
                  preferred_element_type=jnp.float32) + bqkv_ref[...]   # (S, 3H)

    wo = wo_ref[...]                               # (H, H) bf16
    attn = jnp.zeros_like(x)                       # (S, H) f32 accumulator
    for h in range(num_heads):
        q = qkv[:, h * head_dim:(h + 1) * head_dim]
        k = qkv[:, hidden + h * head_dim: hidden + (h + 1) * head_dim]
        v = qkv[:, 2 * hidden + h * head_dim: 2 * hidden + (h + 1) * head_dim]
        s = jnp.dot(q.astype(jnp.bfloat16), k.astype(jnp.bfloat16).T,
                    preferred_element_type=jnp.float32) * scale + bias  # (S, S)
        s = s - jnp.max(s, axis=-1, keepdims=True)
        p = jnp.exp(s)
        p = p * pl.reciprocal(jnp.sum(p, axis=-1, keepdims=True), approx=True)
        ctx = jnp.dot(p.astype(jnp.bfloat16), v.astype(jnp.bfloat16),
                      preferred_element_type=jnp.float32)               # (S, dh)
        # Per-head slice of the output projection (avoids a concat + transpose).
        attn = attn + jnp.dot(ctx.astype(jnp.bfloat16),
                              wo[h * head_dim:(h + 1) * head_dim, :],
                              preferred_element_type=jnp.float32)
    attn = attn + bo_ref[...]

    x1 = _layernorm(attn + x, ln1_g_ref[...], ln1_b_ref[...], eps)

    h1 = jnp.dot(x1.astype(jnp.bfloat16), w1_ref[...],
                 preferred_element_type=jnp.float32) + b1_ref[...]
    # TODO(synk): HuggingFace BERT default is exact erf GELU; tanh approximation used here.
    h1 = jax.nn.gelu(h1, approximate=True)
    h2 = jnp.dot(h1.astype(jnp.bfloat16), w2_ref[...],
                 preferred_element_type=jnp.float32) + b2_ref[...]

    out = _layernorm(h2 + x1, ln2_g_ref[...], ln2_b_ref[...], eps)
    o_ref[...] = out[None].astype(o_ref.dtype)


def encoder_layer(x, mask_b, lyr, *, num_heads, head_dim, eps=1e-12):
    B, S, H = x.shape
    I = lyr["w1"].shape[1]
    nh, dh = num_heads, head_dim

    flops = B * (2 * S * H * 3 * H            # fused QKV
                 + nh * 4 * S * S * dh        # scores + context
                 + 2 * S * H * H              # output projection
                 + 4 * S * H * I)             # FFN (w1 + w2)
    transcendentals = B * (nh * S * S + S * I)
    bytes_accessed = (2 * B * S * H * 4 + B * S * 4
                      + 2 * (H * 3 * H + H * H + 2 * H * I)   # bf16 weights
                      + 4 * (3 * H + H + I + H + 4 * H))      # f32 biases / LN params

    def wfull(a):
        return pl.BlockSpec(a.shape, lambda b, n=a.ndim: (0,) * n)

    return pl.pallas_call(
        functools.partial(_encoder_layer_kernel,
                          num_heads=nh, head_dim=dh, eps=eps),
        out_shape=jax.ShapeDtypeStruct((B, S, H), jnp.float32),
        grid=(B,),
        in_specs=[
            pl.BlockSpec((1, S, H), lambda b: (b, 0, 0)),   # x
            pl.BlockSpec((1, 1, S), lambda b: (b, 0, 0)),   # attention mask
            wfull(lyr["wqkv"]), wfull(lyr["bqkv"]),
            wfull(lyr["wo"]), wfull(lyr["bo"]),
            wfull(lyr["ln1_g"]), wfull(lyr["ln1_b"]),
            wfull(lyr["w1"]), wfull(lyr["b1"]),
            wfull(lyr["w2"]), wfull(lyr["b2"]),
            wfull(lyr["ln2_g"]), wfull(lyr["ln2_b"]),
        ],
        out_specs=pl.BlockSpec((1, S, H), lambda b: (b, 0, 0)),
        compiler_params=pltpu.CompilerParams(dimension_semantics=("parallel",)),
        cost_estimate=pl.CostEstimate(flops=flops,
                                      transcendentals=transcendentals,
                                      bytes_accessed=bytes_accessed),
    )(x, mask_b,
      lyr["wqkv"], lyr["bqkv"], lyr["wo"], lyr["bo"],
      lyr["ln1_g"], lyr["ln1_b"], lyr["w1"], lyr["b1"],
      lyr["w2"], lyr["b2"], lyr["ln2_g"], lyr["ln2_b"])


# -------------------------- DMBERT head kernel -------------------------------

def _dmbert_head_kernel(seq_ref, maskL_ref, maskR_ref, wL_ref, wR_ref, b_ref, o_ref):
    # Fused dynamic multi-pooling + classifier:
    #   pooledL[b,h] = max_s (seq[b,s,h] * maskL[b,s] + 1) - 1
    #   logits       = concat(pooledL, pooledR) @ W.T + b  (split L/R halves, no concat)
    seq = seq_ref[...]                              # (B, S, H) f32
    mL = maskL_ref[...][:, :, None]                 # (B, S, 1)
    mR = maskR_ref[...][:, :, None]
    pooledL = jnp.max(seq * mL + 1.0, axis=1) - 1.0  # (B, H)  (+1/-1 kept for parity)
    pooledR = jnp.max(seq * mR + 1.0, axis=1) - 1.0
    logits = jnp.dot(pooledL.astype(jnp.bfloat16), wL_ref[...],
                     preferred_element_type=jnp.float32)
    logits = logits + jnp.dot(pooledR.astype(jnp.bfloat16), wR_ref[...],
                              preferred_element_type=jnp.float32)
    o_ref[...] = logits + b_ref[...]


def dmbert_head(seq_out, maskL, maskR, fc_w, fc_b):
    B, S, H = seq_out.shape
    C = fc_w.shape[0]                               # fc_w: (C, 2H) like nn.Linear.weight
    wT = fc_w.T.astype(jnp.bfloat16)                # (2H, C)
    wL, wR = wT[:H], wT[H:]
    return pl.pallas_call(
        _dmbert_head_kernel,
        out_shape=jax.ShapeDtypeStruct((B, C), jnp.float32),
        in_specs=[_VMEM] * 6,
        out_specs=_VMEM,
    )(seq_out, maskL, maskR, wL, wR, fc_b)


# ------------------------- synthetic BERT encoder ---------------------------

def init_params(key, cfg):
    H, I, L = cfg["hidden"], cfg["intermediate"], cfg["layers"]
    keys = iter(jax.random.split(key, 8 + 8 * L))

    def nrm(shape, dtype=jnp.float32):
        return (0.02 * jax.random.normal(next(keys), shape, jnp.float32)).astype(dtype)

    params = dict(
        word_emb=nrm((cfg["vocab"], H)),
        pos_emb=nrm((cfg["max_pos"], H)),
        type_emb=nrm((cfg["type_vocab"], H)),
        emb_ln_g=jnp.ones((1, H), jnp.float32),
        emb_ln_b=jnp.zeros((1, H), jnp.float32),
        fc_w=nrm((cfg["num_class"], 2 * H)),          # PyTorch nn.Linear.weight layout
        fc_b=jnp.zeros((1, cfg["num_class"]), jnp.float32),
        layers=[],
    )
    for _ in range(L):
        params["layers"].append(dict(
            wqkv=nrm((H, 3 * H), jnp.bfloat16),        # fused Q|K|V projection (bf16 MXU)
            bqkv=jnp.zeros((1, 3 * H), jnp.float32),
            wo=nrm((H, H), jnp.bfloat16),
            bo=jnp.zeros((1, H), jnp.float32),
            ln1_g=jnp.ones((1, H), jnp.float32),
            ln1_b=jnp.zeros((1, H), jnp.float32),
            w1=nrm((H, I), jnp.bfloat16),
            b1=jnp.zeros((1, I), jnp.float32),
            w2=nrm((I, H), jnp.bfloat16),
            b2=jnp.zeros((1, H), jnp.float32),
            ln2_g=jnp.ones((1, H), jnp.float32),
            ln2_b=jnp.zeros((1, H), jnp.float32),
        ))
    return params


def bert_encoder(params, input_ids, token_type_ids, attention_mask, cfg):
    B, S = input_ids.shape
    H, nh = cfg["hidden"], cfg["heads"]
    dh = H // nh

    # Embedding gathers are glue (plain JAX); everything else is Pallas.
    x = (params["word_emb"][input_ids]
         + params["pos_emb"][jnp.arange(S)][None, :, :]
         + params["type_emb"][token_type_ids]).astype(jnp.float32)
    x = pallas_layernorm(x, params["emb_ln_g"], params["emb_ln_b"])

    # Attention mask stays tiny (B, 1, S); additive bias is built in-kernel.
    mask_b = attention_mask.astype(jnp.float32).reshape(B, 1, S)

    for lyr in params["layers"]:
        x = encoder_layer(x, mask_b, lyr, num_heads=nh, head_dim=dh)
    return x                                          # (B, S, H)


# ------------------------------- DMBERT forward -----------------------------

def dmbert_forward(params, data, cfg):
    seq_out = bert_encoder(params, data["input_ids"], data["token_type_ids"],
                           data["attention_mask"], cfg)
    # TODO(synk): nn.Dropout is identity at inference; no dropout applied here.
    logits = dmbert_head(seq_out, data["maskL"], data["maskR"],
                         params["fc_w"], params["fc_b"])
    label = data.get("event_type", None)
    return label, logits


if __name__ == "__main__":
    cfg = dict(vocab=50, hidden=32, heads=2, intermediate=64, layers=2,
               max_pos=16, type_vocab=2, num_class=4, max_seq_len=8)
    B, S = 2, cfg["max_seq_len"]

    key = jax.random.PRNGKey(0)
    pkey, dkey = jax.random.split(key)
    params = init_params(pkey, cfg)

    k1, _ = jax.random.split(dkey)
    input_ids = jax.random.randint(k1, (B, S), 0, cfg["vocab"], dtype=jnp.int32)
    attention_mask = jnp.ones((B, S), jnp.int32)
    token_type_ids = jnp.zeros((B, S), jnp.int32)
    trig = jnp.array([2, 5], dtype=jnp.int32)                 # trigger positions
    pos = jnp.arange(S)[None, :]
    maskL = (pos <= trig[:, None]).astype(jnp.float32)
    maskR = (pos >= trig[:, None]).astype(jnp.float32)
    event_type = jnp.array([1, 3], dtype=jnp.int32)

    data = dict(input_ids=input_ids, attention_mask=attention_mask,
                token_type_ids=token_type_ids, maskL=maskL, maskR=maskR,
                event_type=event_type)

    label, logits = dmbert_forward(params, data, cfg)
    logits = jax.block_until_ready(logits)
    assert logits.shape == (B, cfg["num_class"])
    assert jnp.all(jnp.isfinite(logits))
    assert label is not None
    print("KERNEL_OK")
</pallas_src>

<mosaic_0001>
module attributes {stable_mosaic.version = 11 : i64} {
  func.func @_ln_kernel(%arg0: memref<2x8x32xf32, #tpu.memory_space<vmem>>, %arg1: memref<1x32xf32, #tpu.memory_space<vmem>>, %arg2: memref<1x32xf32, #tpu.memory_space<vmem>>, %arg3: memref<2x8x32xf32, #tpu.memory_space<vmem>>) attributes {dimension_semantics = [], scalar_prefetch = 0 : i64, scratch_operands = 0 : i64, tpu.core_type = #tpu.core_type<tc>} {
    %c0 = arith.constant 0 : index
    %c0_0 = arith.constant 0 : index
    %c0_1 = arith.constant 0 : index
    %0 = vector.load %arg0[%c0, %c0_0, %c0_1] : memref<2x8x32xf32, #tpu.memory_space<vmem>>, vector<2x8x32xf32>
    %c0_2 = arith.constant 0 : index
    %c0_3 = arith.constant 0 : index
    %1 = vector.load %arg1[%c0_2, %c0_3] : memref<1x32xf32, #tpu.memory_space<vmem>>, vector<1x32xf32>
    %c0_4 = arith.constant 0 : index
    %c0_5 = arith.constant 0 : index
    %2 = vector.load %arg2[%c0_4, %c0_5] : memref<1x32xf32, #tpu.memory_space<vmem>>, vector<1x32xf32>
    %cst = arith.constant dense<0.000000e+00> : vector<2x8xf32>
    %3 = vector.multi_reduction <add>, %0, %cst [2] : vector<2x8x32xf32> to vector<2x8xf32>
    %4 = vector.shape_cast %3 : vector<2x8xf32> to vector<2x8x1xf32>
    %cst_6 = arith.constant 3.200000e+01 : f32
    %5 = vector.broadcast %cst_6 : f32 to vector<2x8x1xf32>
    %6 = arith.divf %4, %5 : vector<2x8x1xf32>
    %7 = vector.broadcast %6 : vector<2x8x1xf32> to vector<2x8x32xf32>
    %8 = arith.subf %0, %7 : vector<2x8x32xf32>
    %9 = arith.mulf %8, %8 : vector<2x8x32xf32>
    %cst_7 = arith.constant dense<0.000000e+00> : vector<2x8xf32>
    %10 = vector.multi_reduction <add>, %9, %cst_7 [2] : vector<2x8x32xf32> to vector<2x8xf32>
    %11 = vector.shape_cast %10 : vector<2x8xf32> to vector<2x8x1xf32>
    %cst_8 = arith.constant 3.200000e+01 : f32
    %12 = vector.broadcast %cst_8 : f32 to vector<2x8x1xf32>
    %13 = arith.divf %11, %12 : vector<2x8x1xf32>
    %cst_9 = arith.constant 9.99999996E-13 : f32
    %14 = vector.broadcast %cst_9 : f32 to vector<2x8x1xf32>
    %15 = arith.addf %13, %14 : vector<2x8x1xf32>
    %16 = math.rsqrt %15 : vector<2x8x1xf32>
    %17 = vector.broadcast %16 : vector<2x8x1xf32> to vector<2x8x32xf32>
    %18 = arith.mulf %8, %17 : vector<2x8x32xf32>
    %19 = vector.shape_cast %1 : vector<1x32xf32> to vector<1x1x32xf32>
    %20 = vector.broadcast %19 : vector<1x1x32xf32> to vector<2x8x32xf32>
    %21 = arith.mulf %18, %20 : vector<2x8x32xf32>
    %22 = vector.shape_cast %2 : vector<1x32xf32> to vector<1x1x32xf32>
    %23 = vector.broadcast %22 : vector<1x1x32xf32> to vector<2x8x32xf32>
    %24 = arith.addf %21, %23 : vector<2x8x32xf32>
    %c0_10 = arith.constant 0 : index
    %c0_11 = arith.constant 0 : index
    %c0_12 = arith.constant 0 : index
    %25 = vector.load %arg3[%c0_10, %c0_11, %c0_12] : memref<2x8x32xf32, #tpu.memory_space<vmem>>, vector<2x8x32xf32>
    tpu.vector_store %arg3[%c0_10, %c0_11, %c0_12], %24 {strides = array<i32>} : memref<2x8x32xf32, #tpu.memory_space<vmem>>, vector<2x8x32xf32>,
    return
  }
}

</mosaic_0001>

<bundles_post_ra>
// kernel: tpu_custom_call.1
= control target key start
LH: loop header
LB: loop body
LE: loop exit
PB: predicated region body
PF: predicated region fallthrough
CT: control target
= control target key end

     0   :  { %8 = vsyncpa [#allocation3], 0  ;;  %s220_s0 = inlined_call_operand.hbm [shape: f32[2,8,32], index: 0, kind: input, shape index: {}]   ;;  %s221_s1 = inlined_call_operand.vmem [shape: f32[1,32], index: 1, kind: input, shape index: {}]   ;;  %s222_s2 = inlined_call_operand.vmem [shape: f32[1,32], index: 2, kind: input, shape index: {}]   ;;  %s223_s3 = inlined_call_operand.hbm [shape: f32[2,8,32], index: 3, kind: output, shape index: {}]  }
   0x1   :  { %9 = vsyncpa [#allocation4], 0  ;;  %s154_s12 = smov [#allocation2]   ;;  %s106_s16 = scalar_lea.hbm %s220_s0, 256 }
   0x2   :  { %s15_s13 = sshll.u32 %s154_s12, 4  ;;  %p107_p0 = scmp.ne.s32.totalorder %s220_s0, %s106_s16  ;;  %s16_s13 = int_to_ptr.vmem [resolvable:$true] %s15_s13 }
   0x3   :  { %p110_p1 = scmp.lt.u32.totalorder %s106_s16, %s220_s0 }
   0x5   :  { %p112_p2 = pnand %p110_p1, %p107_p0 }
   0x7   :  { %115 = shalt.err (!%p112_p2)
}
   0x8   :  { %s116_s21 = scalar_lea.vmem %s16_s13, 256  ;;  %p121_p4 = scmp.lt.s32.totalorder %s16_s13, %s16_s13 }
   0x9   :  { %p117_p3 = scmp.ne.s32.totalorder %s16_s13, %s116_s21  ;;  %p122_p5 = scmp.lt.s32.totalorder %s116_s21, %s116_s21 }
   0xb   :  { %p123_p6 = por %p122_p5, %p121_p4 }
   0xd   :  { %p124_p7 = pnand %p123_p6, %p117_p3 }
   0xf   :  { %127 = shalt.err (!%p124_p7)
}
  0x10   :  { %s155_s22 = smov 128   ;;  %s156_s23 = smov 8  }
  0x11   :  { %21 = dma.hbm_to_vmem [thread:$0]  %s220_s0, 256, %s16_s13, [#allocation3], %s155_s22, %s155_s22, %s156_s23  }
  0x12   :  { %150 = dma.done.wait [#allocation3], 256  }
  0x13   :  { %151 = vsyncadd [#allocation3], 4294967040  ;;  %vm33_vm0 = vcmask 261120   ;;  %v29_v0 = vld [vmem:[#allocation2] sm:$0xff]  ;;  %v30_v1 = vld [vmem:[#allocation2 + $0x8] sm:$0xff]  ;;  %s157_s29 = smov [#allocation5]  }
  0x14   :  { %v34_v2 = vsel %vm33_vm0, %v29_v0, 0.0  ;;  %v37_v3 = vsel %vm33_vm0, %v30_v1, 0.0  ;;  %v96_v21 = vld [vmem:[%s221_s1] ss:$0 sm:$0xff]  ;;  %s84_s30 = sshll.u32 %s157_s29, 4  ;;  %s85_s30 = int_to_ptr.vmem [resolvable:$true] %s84_s30 }
  0x15   :  { %35 = vadd.xlane.f32.xlu0 %v34_v2  ;;  %v97_v23 = vld [vmem:[%s222_s2] ss:$0 sm:$0xff]  ;;  %s128_s4 = scalar_lea.vmem %s85_s30, 256  ;;  %p133_p9 = scmp.lt.s32.totalorder %s85_s30, %s85_s30 }
  0x16   :  { %p129_p8 = scmp.ne.s32.totalorder %s85_s30, %s128_s4  ;;  %p134_p10 = scmp.lt.s32.totalorder %s128_s4, %s128_s4 }
  0x18   :  { %p135_p11 = por %p134_p10, %p133_p9 }
  0x19   :  { %38 = vadd.xlane.f32.xlu0 %v37_v3 }
  0x1a   :  { %p136_p12 = pnand %p135_p11, %p129_p8 }
  0xa2   :  { %v36_v4 = vpop.xlane.xlu0 %35 }
  0xa3   :  { %v41_v5 = vmul.f32 0.03125, %v36_v4 }
  0xa5   :  { %v43_v6 = vsub.f32 %v29_v0, %v41_v5 }
  0xa6   :  { %v39_v7 = vpop.xlane.xlu0 %38 }
  0xa7   :  { %v42_v8 = vmul.f32 0.03125, %v39_v7  ;;  %v45_v9 = vmul.f32 %v43_v6, %v43_v6 }
  0xa9   :  { %v44_v10 = vsub.f32 %v30_v1, %v42_v8  ;;  %v47_v11 = vsel %vm33_vm0, %v45_v9, 0.0 }
  0xaa   :  { %48 = vadd.xlane.f32.xlu1 %v47_v11 }
  0xab   :  { %v46_v12 = vmul.f32 %v44_v10, %v44_v10 }
  0xad   :  { %v50_v13 = vsel %vm33_vm0, %v46_v12, 0.0 }
  0xae   :  { %51 = vadd.xlane.f32.xlu1 %v50_v13 }
 0x137   :  { %v49_v14 = vpop.xlane.xlu1 %48 }
 0x138   :  { %v53_v15 = vmul.f32 0.03125, %v49_v14 }
 0x13a   :  { %v55_v16 = vadd.f32 1e-12, %v53_v15 }
 0x13b   :  { %v52_v17 = vpop.xlane.xlu1 %51 }
 0x13c   :  { %102 = vrsqrt.f32 %v55_v16  ;;  %v54_v18 = vmul.f32 0.03125, %v52_v17 }
 0x13e   :  { %v56_v19 = vadd.f32 1e-12, %v54_v18 }
 0x140   :  { %104 = vrsqrt.f32 %v56_v19 }
 0x146   :  { %v103_v20 = vpop.eup %102 }
 0x147   :  { %v59_v22 = vmul.f32 %v103_v20, %v43_v6 }
 0x149   :  { %v67_v24 = vmul.f32 %v96_v21, %v59_v22 }
 0x14a   :  { %v105_v25 = vpop.eup %104 }
 0x14b   :  { %v60_v26 = vmul.f32 %v105_v25, %v44_v10  ;;  %v75_v27 = vadd.f32 %v97_v23, %v67_v24 }
 0x14d   :  { %v68_v28 = vmul.f32 %v96_v21, %v60_v26  ;;  %77 = vst.msk [vmem:[#allocation5] sm:$0xff] %vm33_vm0, %v75_v27 }
 0x14f   :  { %v76_v29 = vadd.f32 %v97_v23, %v68_v28 }
 0x151   :  { %78 = vst.msk [vmem:[#allocation5 + $0x8] sm:$0xff] %vm33_vm0, %v76_v29 }
 0x152   :  { %139 = shalt.err (!%p136_p12)
}
 0x153   :  { %s140_s5 = scalar_lea.hbm %s223_s3, 256 }
 0x154   :  { %p141_p13 = scmp.ne.s32.totalorder %s223_s3, %s140_s5  ;;  %p144_p0 = scmp.lt.u32.totalorder %s140_s5, %s223_s3 }
 0x156   :  { %p146_p1 = pnand %p144_p0, %p141_p13 }
 0x158   :  { %149 = shalt.err (!%p146_p1)
}
 0x159   :  { %90 = dma.vmem_to_hbm [thread:$0]  %s85_s30, 256, %s223_s3, [#allocation4], %s155_s22, %s155_s22, %s156_s23  }
 0x15a   :  { %152 = dma.done.wait [#allocation4], 256  }
 0x15b   :  { %153 = vsyncadd [#allocation4], 4294967040 }
 0x15c   :  { %94 = vsyncpa [#allocation3], 1 }
 0x15d   :  { %95 = vsyncpa [#allocation4], 1 }

</bundles_post_ra>
